<compile_context>
chip_gen: v7x
topology: tpu7x:2x2x1
jax: 0.10.0
libtpu: 0.0.40
codegen_flags: <defaults>
</compile_context>

<pallas_src>
import functools
import math

import jax
import jax.numpy as jnp
from jax.experimental import pallas as pl
from jax.experimental.pallas import tpu as pltpu


def _round_up(x, m):
    return -(-x // m) * m


# ----------------------------- Pallas kernel ------------------------------ #

def _densenet2d_max_kernel(x_ref, wa_ref, wb_ref, wc_ref, wd_ref, o_ref,
                           *, p1, c2, nsample):
    """Fused DenseNet2D (seblock=False) + max over the nsample axis.

    x_ref : (TM, c0+1)        bf16 rows; one row = one (batch, point, sample)
                              position, last lane is a constant 1.0 (bias lane).
    wa_ref: (c0+1, 3*p1+p2)   [w1 | w2_x0 | w3_x0 | w4_x0], BN folded, shifts in
                              the last (bias) row, segments 128-lane padded.
    wb_ref: (p1, 2*p1+p2)     [w2_x1 | w3_x1 | w4_x1]
    wc_ref: (p1,   p1+p2)     [w3_x2 | w4_x2]
    wd_ref: (p1,       p2)    [w4_x3]
    o_ref : (TM//nsample, c2) f32, max over each group of `nsample` rows.
    """
    x0 = x_ref[...]                                               # (TM, c0+1) bf16
    bf = x0.dtype
    tm = x0.shape[0]

    # One wide MXU matmul per distinct LHS activation; every segment boundary is
    # 128-lane aligned, so the slices/adds below are whole-vreg operations.
    za = jnp.dot(x0, wa_ref[...], preferred_element_type=jnp.float32)        # (TM, 3p1+p2)
    h1 = jnp.maximum(za[:, :p1], 0.0)                                        # stage 1
    zb = jnp.dot(h1.astype(bf), wb_ref[...], preferred_element_type=jnp.float32)
    h2 = jnp.maximum(za[:, p1:2 * p1] + zb[:, :p1], 0.0)                     # stage 2
    zc = jnp.dot(h2.astype(bf), wc_ref[...], preferred_element_type=jnp.float32)
    h3 = jnp.maximum(za[:, 2 * p1:3 * p1] + zb[:, p1:2 * p1] + zc[:, :p1], 0.0)
    zd = jnp.dot(h3.astype(bf), wd_ref[...], preferred_element_type=jnp.float32)
    x4 = jnp.maximum(za[:, 3 * p1:] + zb[:, 2 * p1:] + zc[:, p1:] + zd, 0.0)  # (TM, p2)

    # Fused max over the sample axis: rows are laid out with samples innermost and
    # tile_m % nsample == 0, so every group lives entirely inside this tile.
    # (Edge-tile garbage rows only form groups past the output extent -> masked.)
    grp = jnp.max(x4.reshape(tm // nsample, nsample, x4.shape[1]), axis=1)    # (TG, p2)
    o_ref[...] = grp[:, :c2].astype(o_ref.dtype)


def densenet2d_max_pallas(rows, params, *, nsample, out_channels, tile_m=2048):
    """rows: [R, c0+1] bf16 (bias lane last) -> [R // nsample, out_channels] f32."""
    R, cin = rows.shape
    assert R % nsample == 0, (R, nsample)
    wa, wb, wc, wd = params["wa"], params["wb"], params["wc"], params["wd"]
    p1 = wb.shape[0]
    c2 = out_channels
    G = R // nsample

    # Row tile: multiple of lcm(8*nsample, 16) so (a) tiles hold whole sample
    # groups, (b) the output block height is a multiple of 8 sublanes, (c) bf16
    # input rows pack cleanly.  Cap so the grid has >= 2 steps when the problem
    # allows it (lets 'parallel' shard across both v7x TensorCores).  v6e with
    # very large R can raise tile_m (e.g. 8192) to amortize per-step overhead.
    unit = (8 * nsample) * 16 // math.gcd(8 * nsample, 16)
    r_pad = _round_up(R, unit)
    tile_m = max(unit, (min(tile_m, r_pad) // unit) * unit)
    if r_pad >= 2 * unit:
        tile_m = min(tile_m, _round_up(-(-R // 2), unit))
    tile_g = tile_m // nsample
    grid = (pl.cdiv(R, tile_m),)

    def full_spec(arr):
        return pl.BlockSpec(arr.shape, lambda i: (0, 0))

    # Advisory scheduling hint for XLA.
    flops = 2 * R * (cin * wa.shape[1] + p1 * (wb.shape[1] + wc.shape[1] + wd.shape[1]))
    bytes_accessed = (R * cin * rows.dtype.itemsize + G * c2 * 4
                      + 2 * (wa.size + wb.size + wc.size + wd.size))
    cost = pl.CostEstimate(flops=int(flops), transcendentals=0,
                           bytes_accessed=int(bytes_accessed))

    # TODO(synk): fusing the ball-query gather into the kernel (scalar-prefetched
    # index table + pl.Element/manual DMA) would remove the [R, c0+1] HBM pass;
    # kept in JAX glue here to avoid data-dependent DMA complexity.
    return pl.pallas_call(
        functools.partial(_densenet2d_max_kernel, p1=p1, c2=c2, nsample=nsample),
        out_shape=jax.ShapeDtypeStruct((G, c2), jnp.float32),
        grid_spec=pltpu.PrefetchScalarGridSpec(
            num_scalar_prefetch=0,
            grid=grid,
            in_specs=[pl.BlockSpec((tile_m, cin), lambda i: (i, 0)),
                      full_spec(wa), full_spec(wb), full_spec(wc), full_spec(wd)],
            out_specs=pl.BlockSpec((tile_g, c2), lambda i: (i, 0))),
        compiler_params=pltpu.CompilerParams(
            dimension_semantics=("parallel",),
            vmem_limit_bytes=48 * 1024 * 1024),
        cost_estimate=cost,
    )(rows, wa, wb, wc, wd)


# ------------------------------ JAX glue ---------------------------------- #

def square_distance(src, dst):
    """src: [B,N,C], dst: [B,M,C] -> [B,N,M] squared euclidean distances."""
    d = -2.0 * jnp.einsum("bnc,bmc->bnm", src, dst)
    d = d + jnp.sum(src * src, axis=-1)[:, :, None]
    d = d + jnp.sum(dst * dst, axis=-1)[:, None, :]
    return d


def index_points(points, idx):
    """points: [B,N,C]; idx: [B,...] int -> [B,...,C] per-batch gather."""
    return jax.vmap(lambda p, i: p[i])(points, idx)


def farthest_point_sample(xyz, npoint):
    """xyz: [B,N,3] -> [B,npoint] int32 FPS indices."""
    # TODO(synk): PyTorch reference starts FPS from a random index; deterministic 0 here.
    B, N, _ = xyz.shape

    def body(i, state):
        centroids, distance, farthest = state
        centroids = centroids.at[:, i].set(farthest)
        centroid = jax.vmap(lambda p, f: p[f])(xyz, farthest)[:, None, :]   # [B,1,3]
        dist = jnp.sum((xyz - centroid) ** 2, axis=-1)                      # [B,N]
        distance = jnp.minimum(distance, dist)
        farthest = jnp.argmax(distance, axis=-1).astype(jnp.int32)
        return centroids, distance, farthest

    init = (jnp.zeros((B, npoint), jnp.int32),
            jnp.full((B, N), 1e10, jnp.float32),
            jnp.zeros((B,), jnp.int32))
    centroids, _, _ = jax.lax.fori_loop(0, npoint, body, init)
    return centroids


def query_ball_point(radius, nsample, xyz, new_xyz):
    """xyz: [B,N,3], new_xyz: [B,S,3] -> [B,S,nsample] int32 group indices."""
    B, N, _ = xyz.shape
    S = new_xyz.shape[1]
    sqrdists = square_distance(new_xyz, xyz)                        # [B,S,N]
    group_idx = jnp.broadcast_to(jnp.arange(N, dtype=jnp.int32), (B, S, N))
    group_idx = jnp.where(sqrdists > radius ** 2, N, group_idx)
    group_idx = jnp.sort(group_idx, axis=-1)[:, :, :nsample]
    group_first = jnp.broadcast_to(group_idx[:, :, :1], group_idx.shape)
    group_idx = jnp.where(group_idx == N, group_first, group_idx)
    return group_idx


def sample_and_group(npoint, radius, nsample, xyz, points, normalize_radius,
                     append_ones=False, out_dtype=None):
    """Returns new_xyz [B,np,3] and new_points [B,np,ns,3+D(+1)]."""
    fps_idx = farthest_point_sample(xyz, npoint)                    # [B,np]
    new_xyz = index_points(xyz, fps_idx)                            # [B,np,3]
    idx = query_ball_point(radius, nsample, xyz, new_xyz)           # [B,np,ns]
    grouped_xyz = index_points(xyz, idx)                            # [B,np,ns,3]
    grouped_xyz_norm = grouped_xyz - new_xyz[:, :, None, :]
    if normalize_radius:
        grouped_xyz_norm = grouped_xyz_norm / radius
    parts = [grouped_xyz_norm]
    if points is not None:
        parts.append(index_points(points, idx))                     # [B,np,ns,D]
    if append_ones:
        B, S = new_xyz.shape[0], new_xyz.shape[1]
        parts.append(jnp.ones((B, S, nsample, 1), xyz.dtype))       # bias lane
    new_points = jnp.concatenate(parts, axis=-1)
    if out_dtype is not None:
        new_points = new_points.astype(out_dtype)                   # cast fuses with gather
    return new_xyz, new_points


def sample_and_group_all(xyz, points, append_ones=False, out_dtype=None):
    B, N, C = xyz.shape
    new_xyz = jnp.zeros((B, 1, C), xyz.dtype)
    parts = [xyz[:, None, :, :]]
    if points is not None:
        parts.append(points[:, None, :, :])
    if append_ones:
        parts.append(jnp.ones((B, 1, N, 1), xyz.dtype))
    new_points = jnp.concatenate(parts, axis=-1)
    if out_dtype is not None:
        new_points = new_points.astype(out_dtype)
    return new_xyz, new_points


def pnsa_densenet_forward(xyz, points, params, *, npoint, radius, nsample,
                          out_channels, normalize_radius=False, group_all=False,
                          tile_m=2048):
    """PNSADenseNet.forward: (new_xyz [B,np,3], new_points_dense [B,np,c2])."""
    if group_all:
        new_xyz, new_points = sample_and_group_all(
            xyz, points, append_ones=True, out_dtype=jnp.bfloat16)
    else:
        new_xyz, new_points = sample_and_group(
            npoint, radius, nsample, xyz, points, normalize_radius,
            append_ones=True, out_dtype=jnp.bfloat16)
    B, S, K, cin = new_points.shape                                 # [B, np, ns, 3+D+1]
    # permute(0,3,2,1) -> DenseNet2D(1x1 convs) -> max over nsample -> permute(0,2,1)
    # == per-row channel matmuls + grouped max, all fused inside the Pallas kernel.
    rows = new_points.reshape(B * S * K, cin)
    out_rows = densenet2d_max_pallas(rows, params, nsample=K,
                                     out_channels=out_channels, tile_m=tile_m)
    return new_xyz, out_rows.reshape(B, S, out_channels)


# ------------------------- deterministic params ---------------------------- #

def init_raw_params(key, channel_list):
    """Raw (torch-equivalent) DenseNet2D params: conv weights/biases + BN stats."""
    c0, c1, c2 = channel_list
    ks = jax.random.split(key, 8)

    def conv(k, cin, cout):  # torch Conv2d 1x1 weight -> [out, in]
        kw, kb = jax.random.split(k)
        return (0.1 * jax.random.normal(kw, (cout, cin), jnp.float32),
                0.1 * jax.random.normal(kb, (cout,), jnp.float32))

    def bn(k, c):            # eval-mode BatchNorm2d stats (gamma, beta, mean, var)
        k1, k2, k3, k4 = jax.random.split(k, 4)
        return (1.0 + 0.1 * jax.random.normal(k1, (c,), jnp.float32),
                0.1 * jax.random.normal(k2, (c,), jnp.float32),
                0.1 * jax.random.normal(k3, (c,), jnp.float32),
                1.0 + jnp.abs(jax.random.normal(k4, (c,), jnp.float32)))

    w1, b1 = conv(ks[0], c0, c1)
    w2, b2 = conv(ks[1], c0 + c1, c1)
    w3, b3 = conv(ks[2], c0 + 2 * c1, c1)
    w4, b4 = conv(ks[3], c0 + 3 * c1, c2)
    return dict(w1=w1, b1=b1, w2=w2, b2=b2, w3=w3, b3=b3, w4=w4, b4=b4,
                bn1=bn(ks[4], c1), bn2=bn(ks[5], c1),
                bn3=bn(ks[6], c1), bn4=bn(ks[7], c2))


def pack_params(raw, eps=1e-5):
    """Fold eval-mode BN into the weights and pack them lane-aligned for the kernel.

    wa: [w1 | w2_x0 | w3_x0 | w4_x0] + bias row [t1|t2|t3|t4]   (c0+1, 3*p1+p2)
    wb: [w2_x1 | w3_x1 | w4_x1]                                  (p1,   2*p1+p2)
    wc: [w3_x2 | w4_x2]                                          (p1,     p1+p2)
    wd: [w4_x3]                                                  (p1,         p2)
    Every column segment is zero-padded to a 128-lane boundary (p1/p2).
    """
    c1 = raw["w1"].shape[0]
    c0 = raw["w1"].shape[1]
    c2 = raw["w4"].shape[0]
    p1 = _round_up(c1, 128)
    p2 = _round_up(c2, 128)

    def fold(w, b, bn):
        gamma, beta, mean, var = bn
        scale = gamma / jnp.sqrt(var + eps)
        return w.T * scale[None, :], (b - mean) * scale + beta

    w1f, t1 = fold(raw["w1"], raw["b1"], raw["bn1"])
    w2f, t2 = fold(raw["w2"], raw["b2"], raw["bn2"])
    w3f, t3 = fold(raw["w3"], raw["b3"], raw["bn3"])
    w4f, t4 = fold(raw["w4"], raw["b4"], raw["bn4"])

    def padc(w, cp):
        return jnp.pad(w, ((0, 0), (0, cp - w.shape[1])))

    def padr(w, rp):
        return jnp.pad(w, ((0, rp - w.shape[0]), (0, 0)))

    wa = jnp.concatenate([padc(w1f, p1), padc(w2f[:c0], p1),
                          padc(w3f[:c0], p1), padc(w4f[:c0], p2)], axis=1)
    bias = jnp.concatenate([jnp.pad(t1, (0, p1 - c1)), jnp.pad(t2, (0, p1 - c1)),
                            jnp.pad(t3, (0, p1 - c1)), jnp.pad(t4, (0, p2 - c2))])
    wa = jnp.concatenate([wa, bias[None, :]], axis=0)

    wb = padr(jnp.concatenate([padc(w2f[c0:], p1),
                               padc(w3f[c0:c0 + c1], p1),
                               padc(w4f[c0:c0 + c1], p2)], axis=1), p1)
    wc = padr(jnp.concatenate([padc(w3f[c0 + c1:], p1),
                               padc(w4f[c0 + c1:c0 + 2 * c1], p2)], axis=1), p1)
    wd = padr(padc(w4f[c0 + 2 * c1:], p2), p1)

    return {k: v.astype(jnp.bfloat16) for k, v in
            dict(wa=wa, wb=wb, wc=wc, wd=wd).items()}


def densenet2d_reference(x, raw, eps=1e-5):
    """Pure-JAX f32 reference of DenseNet2D (seblock=False), channel-last input."""
    def stage(w, b, bn, inp):
        gamma, beta, mean, var = bn
        z = jnp.einsum("...i,oi->...o", inp, w) + b
        z = (z - mean) * (gamma / jnp.sqrt(var + eps)) + beta
        return jnp.maximum(z, 0.0)

    x0 = x
    x1 = stage(raw["w1"], raw["b1"], raw["bn1"], x0)
    y1 = jnp.concatenate([x0, x1], axis=-1)
    x2 = stage(raw["w2"], raw["b2"], raw["bn2"], y1)
    y2 = jnp.concatenate([y1, x2], axis=-1)
    x3 = stage(raw["w3"], raw["b3"], raw["bn3"], y2)
    y3 = jnp.concatenate([y2, x3], axis=-1)
    return stage(raw["w4"], raw["b4"], raw["bn4"], y3)


# --------------------------------- main ------------------------------------ #

if __name__ == "__main__":
    key = jax.random.PRNGKey(0)
    kxyz, kpts, kparam = jax.random.split(key, 3)

    B, N, C, D = 2, 64, 3, 4                 # batch, points, coord dim, feature dim
    npoint, radius, nsample = 16, 0.8, 8     # SA layer config
    channel_list = [C + D, 16, 32]           # [in, mid, out] for DenseNet2D

    xyz = jax.random.normal(kxyz, (B, N, C), jnp.float32)
    points = jax.random.normal(kpts, (B, N, D), jnp.float32)
    raw = init_raw_params(kparam, channel_list)
    params = pack_params(raw)

    fwd = jax.jit(functools.partial(
        pnsa_densenet_forward,
        npoint=npoint, radius=radius, nsample=nsample,
        out_channels=channel_list[2], normalize_radius=False,
        group_all=False, tile_m=2048))

    new_xyz, out = fwd(xyz, points, params)
    out = jax.block_until_ready(out)

    # f32 reference on the same grouping path (unfused weights) for numerics.
    ref_xyz, ref_points = sample_and_group(npoint, radius, nsample, xyz, points, False)
    ref = jnp.max(densenet2d_reference(ref_points, raw), axis=2)     # [B, np, c2]

    assert new_xyz.shape == (B, npoint, C), new_xyz.shape
    assert out.shape == (B, npoint, channel_list[2]), out.shape
    assert bool(jnp.all(jnp.isfinite(out)))
    assert bool(jnp.allclose(new_xyz, ref_xyz))
    max_err = float(jnp.max(jnp.abs(out - ref)))
    tol = 0.05 + 0.02 * float(jnp.max(jnp.abs(ref)))
    assert max_err < tol, (max_err, tol)
    print("KERNEL_OK")
</pallas_src>

<mosaic_0001>
module attributes {stable_mosaic.version = 11 : i64} {
  func.func @_densenet2d_max_kernel(%arg0: i32, %arg1: memref<128x8xbf16, #tpu.memory_space<vmem>>, %arg2: memref<8x512xbf16, #tpu.memory_space<vmem>>, %arg3: memref<128x384xbf16, #tpu.memory_space<vmem>>, %arg4: memref<128x256xbf16, #tpu.memory_space<vmem>>, %arg5: memref<128x128xbf16, #tpu.memory_space<vmem>>, %arg6: memref<16x32xf32, #tpu.memory_space<vmem>>) attributes {dimension_semantics = [#tpu.dimension_semantics<parallel>], iteration_bounds = array<i64: 2>, scalar_prefetch = 0 : i64, scratch_operands = 0 : i64, tpu.core_type = #tpu.core_type<tc>, window_params = [{transform_indices = @transform_0, window_bounds = array<i64: 128, 8>}, {pipeline_mode = #tpu.pipeline_mode<synchronous>, transform_indices = @transform_1, window_bounds = array<i64: 8, 512>}, {pipeline_mode = #tpu.pipeline_mode<synchronous>, transform_indices = @transform_2, window_bounds = array<i64: 128, 384>}, {pipeline_mode = #tpu.pipeline_mode<synchronous>, transform_indices = @transform_3, window_bounds = array<i64: 128, 256>}, {pipeline_mode = #tpu.pipeline_mode<synchronous>, transform_indices = @transform_4, window_bounds = array<i64: 128, 128>}, {transform_indices = @transform_5, window_bounds = array<i64: 16, 32>}]} {
    %c0 = arith.constant 0 : index
    %c0_0 = arith.constant 0 : index
    %0 = vector.load %arg1[%c0, %c0_0] : memref<128x8xbf16, #tpu.memory_space<vmem>>, vector<128x8xbf16>
    %c0_1 = arith.constant 0 : index
    %c0_2 = arith.constant 0 : index
    %1 = vector.load %arg2[%c0_1, %c0_2] : memref<8x512xbf16, #tpu.memory_space<vmem>>, vector<8x512xbf16>
    %cst = arith.constant dense<0.000000e+00> : vector<128x512xf32>
    %2 = tpu.matmul %0, %1, %cst {dimension_numbers = #tpu.dot_dimension_numbers<[1], [0], [0], [1], [0, 0, 1, 1], [], []>} : vector<128x8xbf16>, vector<8x512xbf16>, vector<128x512xf32> -> vector<128x512xf32>
    %3 = vector.extract_strided_slice %2 {offsets = [0, 0], sizes = [128, 128], strides = [1, 1]} : vector<128x512xf32> to vector<128x128xf32>
    %cst_3 = arith.constant 0.000000e+00 : f32
    %4 = vector.broadcast %cst_3 : f32 to vector<128x128xf32>
    %5 = arith.maximumf %3, %4 : vector<128x128xf32>
    %6 = arith.truncf %5 : vector<128x128xf32> to vector<128x128xbf16>
    %c0_4 = arith.constant 0 : index
    %c0_5 = arith.constant 0 : index
    %7 = vector.load %arg3[%c0_4, %c0_5] : memref<128x384xbf16, #tpu.memory_space<vmem>>, vector<128x384xbf16>
    %cst_6 = arith.constant dense<0.000000e+00> : vector<128x384xf32>
    %8 = tpu.matmul %6, %7, %cst_6 {dimension_numbers = #tpu.dot_dimension_numbers<[1], [0], [0], [1], [0, 0, 1, 1], [], []>} : vector<128x128xbf16>, vector<128x384xbf16>, vector<128x384xf32> -> vector<128x384xf32>
    %9 = vector.extract_strided_slice %2 {offsets = [0, 128], sizes = [128, 128], strides = [1, 1]} : vector<128x512xf32> to vector<128x128xf32>
    %10 = vector.extract_strided_slice %8 {offsets = [0, 0], sizes = [128, 128], strides = [1, 1]} : vector<128x384xf32> to vector<128x128xf32>
    %11 = arith.addf %9, %10 : vector<128x128xf32>
    %cst_7 = arith.constant 0.000000e+00 : f32
    %12 = vector.broadcast %cst_7 : f32 to vector<128x128xf32>
    %13 = arith.maximumf %11, %12 : vector<128x128xf32>
    %14 = arith.truncf %13 : vector<128x128xf32> to vector<128x128xbf16>
    %c0_8 = arith.constant 0 : index
    %c0_9 = arith.constant 0 : index
    %15 = vector.load %arg4[%c0_8, %c0_9] : memref<128x256xbf16, #tpu.memory_space<vmem>>, vector<128x256xbf16>
    %cst_10 = arith.constant dense<0.000000e+00> : vector<128x256xf32>
    %16 = tpu.matmul %14, %15, %cst_10 {dimension_numbers = #tpu.dot_dimension_numbers<[1], [0], [0], [1], [0, 0, 1, 1], [], []>} : vector<128x128xbf16>, vector<128x256xbf16>, vector<128x256xf32> -> vector<128x256xf32>
    %17 = vector.extract_strided_slice %2 {offsets = [0, 256], sizes = [128, 128], strides = [1, 1]} : vector<128x512xf32> to vector<128x128xf32>
    %18 = vector.extract_strided_slice %8 {offsets = [0, 128], sizes = [128, 128], strides = [1, 1]} : vector<128x384xf32> to vector<128x128xf32>
    %19 = arith.addf %17, %18 : vector<128x128xf32>
    %20 = vector.extract_strided_slice %16 {offsets = [0, 0], sizes = [128, 128], strides = [1, 1]} : vector<128x256xf32> to vector<128x128xf32>
    %21 = arith.addf %19, %20 : vector<128x128xf32>
    %cst_11 = arith.constant 0.000000e+00 : f32
    %22 = vector.broadcast %cst_11 : f32 to vector<128x128xf32>
    %23 = arith.maximumf %21, %22 : vector<128x128xf32>
    %24 = arith.truncf %23 : vector<128x128xf32> to vector<128x128xbf16>
    %c0_12 = arith.constant 0 : index
    %c0_13 = arith.constant 0 : index
    %25 = vector.load %arg5[%c0_12, %c0_13] : memref<128x128xbf16, #tpu.memory_space<vmem>>, vector<128x128xbf16>
    %cst_14 = arith.constant dense<0.000000e+00> : vector<128x128xf32>
    %26 = tpu.matmul %24, %25, %cst_14 {dimension_numbers = #tpu.dot_dimension_numbers<[1], [0], [0], [1], [0, 0, 1, 1], [], []>} : vector<128x128xbf16>, vector<128x128xbf16>, vector<128x128xf32> -> vector<128x128xf32>
    %27 = vector.extract_strided_slice %2 {offsets = [0, 384], sizes = [128, 128], strides = [1, 1]} : vector<128x512xf32> to vector<128x128xf32>
    %28 = vector.extract_strided_slice %8 {offsets = [0, 256], sizes = [128, 128], strides = [1, 1]} : vector<128x384xf32> to vector<128x128xf32>
    %29 = arith.addf %27, %28 : vector<128x128xf32>
    %30 = vector.extract_strided_slice %16 {offsets = [0, 128], sizes = [128, 128], strides = [1, 1]} : vector<128x256xf32> to vector<128x128xf32>
    %31 = arith.addf %29, %30 : vector<128x128xf32>
    %32 = arith.addf %31, %26 : vector<128x128xf32>
    %cst_15 = arith.constant 0.000000e+00 : f32
    %33 = vector.broadcast %cst_15 : f32 to vector<128x128xf32>
    %34 = arith.maximumf %32, %33 : vector<128x128xf32>
    %35 = vector.shape_cast %34 : vector<128x128xf32> to vector<16x8x128xf32>
    %cst_16 = arith.constant dense<0xFF800000> : vector<16x128xf32>
    %36 = vector.multi_reduction <maximumf>, %35, %cst_16 [1] : vector<16x8x128xf32> to vector<16x128xf32>
    %37 = vector.extract_strided_slice %36 {offsets = [0, 0], sizes = [16, 32], strides = [1, 1]} : vector<16x128xf32> to vector<16x32xf32>
    %c0_17 = arith.constant 0 : index
    %c0_18 = arith.constant 0 : index
    %38 = vector.load %arg6[%c0_17, %c0_18] : memref<16x32xf32, #tpu.memory_space<vmem>>, vector<16x32xf32>
    tpu.vector_store %arg6[%c0_17, %c0_18], %37 {strides = array<i32>} : memref<16x32xf32, #tpu.memory_space<vmem>>, vector<16x32xf32>,
    return
  }
  func.func @transform_0(%arg0: i32) -> (i32, i32) {
    %c0_i32 = arith.constant 0 : i32
    %c0_i32_0 = arith.constant 0 : i32
    return %arg0, %c0_i32 : i32, i32
  }
  func.func @transform_1(%arg0: i32) -> (i32, i32) {
    %c0_i32 = arith.constant 0 : i32
    %c0_i32_0 = arith.constant 0 : i32
    %c0_i32_1 = arith.constant 0 : i32
    return %c0_i32, %c0_i32_0 : i32, i32
  }
  func.func @transform_2(%arg0: i32) -> (i32, i32) {
    %c0_i32 = arith.constant 0 : i32
    %c0_i32_0 = arith.constant 0 : i32
    %c0_i32_1 = arith.constant 0 : i32
    return %c0_i32, %c0_i32_0 : i32, i32
  }
  func.func @transform_3(%arg0: i32) -> (i32, i32) {
    %c0_i32 = arith.constant 0 : i32
    %c0_i32_0 = arith.constant 0 : i32
    %c0_i32_1 = arith.constant 0 : i32
    return %c0_i32, %c0_i32_0 : i32, i32
  }
  func.func @transform_4(%arg0: i32) -> (i32, i32) {
    %c0_i32 = arith.constant 0 : i32
    %c0_i32_0 = arith.constant 0 : i32
    %c0_i32_1 = arith.constant 0 : i32
    return %c0_i32, %c0_i32_0 : i32, i32
  }
  func.func @transform_5(%arg0: i32) -> (i32, i32) {
    %c0_i32 = arith.constant 0 : i32
    %c0_i32_0 = arith.constant 0 : i32
    return %arg0, %c0_i32 : i32, i32
  }
}

</mosaic_0001>

<bundles_post_ra>
// kernel: custom-call.8
= control target key start
LH: loop header
LB: loop body
LE: loop exit
PB: predicated region body
PF: predicated region fallthrough
CT: control target
= control target key end

     0   :  { %s6_s0 = inlined_call_operand.vmem [shape: f32[2,64], index: 0, kind: output, shape index: {}]  }

// kernel: pnsa_densenet_forward.1
= control target key start
LH: loop header
LB: loop body
LE: loop exit
PB: predicated region body
PF: predicated region fallthrough
CT: control target
= control target key end

     0   :  { %10 = vsyncpa [#allocation3], 0  ;;  %s2727_s0 = inlined_call_operand.vmem [shape: bf16[256,8], index: 0, kind: input, shape index: {}]   ;;  %s2728_s1 = inlined_call_operand.vmem [shape: bf16[8,512], index: 1, kind: input, shape index: {}]   ;;  %s2729_s2 = inlined_call_operand.vmem [shape: bf16[128,384], index: 2, kind: input, shape index: {}]   ;;  %s2730_s3 = inlined_call_operand.vmem [shape: bf16[128,256], index: 3, kind: input, shape index: {}]   ;;  %s2731_s4 = inlined_call_operand.vmem [shape: bf16[128,128], index: 4, kind: input, shape index: {}]   ;;  %s2732_s5 = inlined_call_operand.hbm [shape: f32[32,32], index: 5, kind: output, shape index: {}]  }
   0x1   :  { %12 = vsyncpa [#allocation3 + $0x1], 0  ;;  %s2100_s18 = smov 0   ;;  %s2102_s19 = smov 0  }
   0x2   :  { %s2104_s20 = smov 0   ;;  %s2106_s21 = smov 0  }
   0x3 LB: > { %s2121_s22 = sadd.s32 4294967295, %s2064_s21   ;;  %s1697_s23 = sadd.s32 4294967294, %s2064_s21   ;;  %s2064_s21 = sphi %s2106_s21, %s2738_s21   ;;  %s2060_s20 = sphi %s2104_s20, %s2737_s20   ;;  %s2056_s19 = sphi %s2102_s19, %s2736_s19   ;;  %s2052_s18 = sphi %s2100_s18, %s2735_s18  }
   0x4   : > { %s2125_s24 = sadd.s32 1, %s2064_s21   ;;  %s135_s25 = sadd.s32 1, %s2060_s20 }
   0x5   : > { %s132_s26 = ssub.s32 %s2064_s21, %s2125_s24  ;;  %p145_p0 = scmp.ne.s32.totalorder %s2060_s20, %s2056_s19 }
   0x6   : > { %p133_p1 = scmp.eq.s32.totalorder %s132_s26, 0  ;;  %p146_p2 = scmp.eq.s32.totalorder %s2121_s22, 1 }
   0x7   : > { %p151_p3 = scmp.ne.s32.totalorder %s2056_s19, %s2052_s18  ;;  %p152_p4 = scmp.eq.s32.totalorder %s1697_s23, 1 }
   0x8   : > { %s2136_s27 = scalar_select %p133_p1, %s2060_s20, %s135_s25  }
   0x9   : > { %p2138_p5 = por %p146_p2, %p145_p0  ;;  %p2142_p6 = por %p152_p4, %p151_p3 }
   0xa   : > { %p1700_p7 = scmp.ge.s32.totalorder %s2064_s21, 1  ;;  %p191_p8 = scmp.lt.s32.totalorder %s2064_s21, 3 }
   0xc   : > { %p192_p9 = pnand %p1700_p7, %p191_p8 }
   0xd   : > { %v243_v0 = vld [vmem:[%s2728_s1] sm:$0xff] (!%p192_p9)  ;;  %vm320_vm0 = vcmask (!%p192_p9), 1043456   ;;  %s1702_s7 = sshll.u32 (!%p192_p9), %s2121_s22, 4  ;;  %v2066_v3 = vmov (!%p192_p9), 0   ;;  %v244_v5 = vld [vmem:[%s2728_s1 + $0x8] sm:$0xff] (!%p192_p9)  ;;  %vm295_vm1 = vcmask (!%p192_p9), 64512  }
   0xe   : > { %195 = sbr.rel (%p192_p9) target bundleno = 988 (0x3dc), region = 40  ;;  %v1713_v1 = vcombine.high (!%p192_p9), %v243_v0, %v243_v0  ;;  %v1712_v2 = vcombine.low (!%p192_p9), %v243_v0, %v243_v0  ;;  %365 = vmatprep.mubr.bf16.mxu0 (!%p192_p9), %v2066_v3  ;;  %p220_p10 = scmp.lt.s32.totalorder (!%p192_p9), %s1702_s7, 31  ;;  %v1938_v4 = vld [vmem:[%s2729_s2 + $0x4] ss:$12 sps:$4 sm:$0xff] (!%p192_p9)   ;;  %478 = vmatprep.mubr.bf16.mxu1 (!%p192_p9), %v2066_v3  ;;  %v1715_v7 = vcombine.high (!%p192_p9), %v244_v5, %v244_v5  ;;  %v1936_v10 = vld [vmem:[%s2729_s2] ss:$12 sps:$4 sm:$0xff] (!%p192_p9)  }
   0xf   : > { %v1714_v8 = vcombine.low (!%p192_p9), %v244_v5, %v244_v5  ;;  %v1943_v11 = vld [vmem:[%s2729_s2 + $0x1c] ss:$12 sps:$4 sm:$0xff] (!%p192_p9)   ;;  %v1941_v13 = vld [vmem:[%s2729_s2 + $0x18] ss:$12 sps:$4 sm:$0xff] (!%p192_p9)   ;;  %v1946_v14 = vld [vmem:[%s2729_s2 + $0x34] ss:$12 sps:$4 sm:$0xff] (!%p192_p9)  }
  0x10   : > { %1716 = vmatprep.subr.msk.bf16.mxu0 (!%p192_p9), %vm320_vm0, %v1713_v1  ;;  %v322_v6 = vsel (!%p192_p9), %vm320_vm0, %v1712_v2, 0  ;;  %1725 = vmatprep.subr.msk.bf16.mxu1 (!%p192_p9), %vm320_vm0, %v1715_v7  ;;  %v1944_v16 = vld [vmem:[%s2729_s2 + $0x30] ss:$12 sps:$4 sm:$0xff] (!%p192_p9)   ;;  %v1949_v17 = vld [vmem:[%s2729_s2 + $0x4c] ss:$12 sps:$4 sm:$0xff] (!%p192_p9)   ;;  %vm1595_vm2 = vcmask (!%p192_p9), 1041409  }
  0x11   : > { %334 = vmatpush1.bf16.msra.mxu0 (!%p192_p9), %v322_v6  ;;  %v328_v9 = vsel (!%p192_p9), %vm320_vm0, %v1714_v8, 0  ;;  %v1947_v18 = vld [vmem:[%s2729_s2 + $0x48] ss:$12 sps:$4 sm:$0xff] (!%p192_p9)   ;;  %v1952_v19 = vld [vmem:[%s2729_s2 + $0x64] ss:$12 sps:$4 sm:$0xff] (!%p192_p9)   ;;  %vm1597_vm3 = vcmask (!%p192_p9), 1042434  }
  0x12   : > { %743 = vmatprep.subr.bf16.mxu0 (!%p192_p9), %v1938_v4  ;;  %447 = vmatpush1.bf16.msra.mxu1 (!%p192_p9), %v328_v9  ;;  %v1956_v20 = vld [vmem:[%s2729_s2 + $0x8] ss:$12 sps:$4 sm:$0xff] (!%p192_p9)   ;;  %v1957_v21 = vld [vmem:[%s2729_s2 + $0x20] ss:$12 sps:$4 sm:$0xff] (!%p192_p9)   ;;  %v1961_v25 = vld [vmem:[%s2729_s2 + $0x38] ss:$12 sps:$4 sm:$0xff] (!%p192_p9)  }
  0x13   : > { %1820 = vmatprep.subr.bf16.mxu1 (!%p192_p9), %v1956_v20  ;;  %v1950_v23 = vld [vmem:[%s2729_s2 + $0x60] ss:$12 sps:$4 sm:$0xff] (!%p192_p9)   ;;  %v1955_v24 = vld [vmem:[%s2729_s2 + $0x7c] ss:$12 sps:$4 sm:$0xff] (!%p192_p9)   ;;  %v1953_v26 = vld [vmem:[%s2729_s2 + $0x78] ss:$12 sps:$4 sm:$0xff] (!%p192_p9)  }
  0x14   : > { %v1960_v27 = vld [vmem:[%s2729_s2 + $0x94] ss:$12 sps:$4 sm:$0xff] (!%p192_p9)   ;;  %v1962_v28 = vld [vmem:[%s2729_s2 + $0x50] ss:$12 sps:$4 sm:$0xff] (!%p192_p9)   ;;  %v1965_v31 = vld [vmem:[%s2729_s2 + $0xac] ss:$12 sps:$4 sm:$0xff] (!%p192_p9)  }
  0x15   : > { %s2740_s7 = smov (!%p220_p10, %s1702_s7), 31  ;;  %v1958_v30 = vld [vmem:[%s2729_s2 + $0x90] ss:$12 sps:$4 sm:$0xff]   ;;  %v1966_v32 = vld [vmem:[%s2729_s2 + $0x68] ss:$12 sps:$4 sm:$0xff]   ;;  %vm1599_vm4 = vcmask 1043459  }
  0x16   : > { %s1703_s12 = sshll.u32 %s2740_s7, 2  ;;  %v1963_v33 = vld [vmem:[%s2729_s2 + $0xa8] ss:$12 sps:$4 sm:$0xff]   ;;  %v1967_v38 = vld [vmem:[%s2729_s2 + $0x80] ss:$12 sps:$4 sm:$0xff]   ;;  %s216_s16 = sand.u32 1, %s2056_s19  }
  0x17   : > { %s2167_s15 = scalar_lea.vmem %s2727_s0, %s1703_s12  ;;  %v1968_v39 = vld [vmem:[%s2729_s2 + $0x98] ss:$12 sps:$4 sm:$0xff]   ;;  %v1969_v40 = vld [vmem:[%s2729_s2 + $0xb0] ss:$12 sps:$4 sm:$0xff]   ;;  %v1970_v63 = vld [vmem:[%s2730_s3] ss:$8 sps:$4 sm:$0xff]  }
  0x18   : > { %v1928_v12 = vld [vmem:[%s2167_s15] sm:$0xff]   ;;  %v1929_v15 = vld [vmem:[%s2167_s15 + $0x8] sm:$0xff]   ;;  %v1930_v22 = vld [vmem:[%s2167_s15 + $0x10] sm:$0xff]   ;;  %vm1601_vm5 = vcmask 1044484   ;;  %vm1603_vm6 = vcmask 1045509   ;;  %vm1605_vm7 = vcmask 1046534  }
  0x19   : > { %1717 = vmatmul.mubr.msk.bf16.vlgmr.msra.gmra.mrb[0].mxu0 %vm295_vm1, %v1928_v12  ;;  %1726 = vmatmul.mubr.msk.bf16.vlgmr.msra.gmra.mrb[0].mxu1 %vm295_vm1, %v1928_v12  ;;  %v1931_v29 = vld [vmem:[%s2167_s15 + $0x18] sm:$0xff]   ;;  %v1932_v34 = vld [vmem:[%s2167_s15 + $0x20] sm:$0xff]   ;;  %v1933_v35 = vld [vmem:[%s2167_s15 + $0x28] sm:$0xff]   ;;  %s1701_s17 = sshll.u32 %s216_s16, 4  ;;  %vm1607_vm8 = vcmask 1047559   ;;  %vm1618_vm9 = vcmask 261120  }
  0x1a   : > { %375 = vmatprep.mubr.bf16.mxu0 %v2066_v3  ;;  %744 = vmatpush1.bf16.msra.mxu0 %v1936_v10  ;;  %v1934_v36 = vld [vmem:[%s2167_s15 + $0x30] sm:$0xff]   ;;  %v1935_v37 = vld [vmem:[%s2167_s15 + $0x38] sm:$0xff]   ;;  %v1972_v41 = vld [vmem:[%s2730_s3 + $0x4] ss:$8 sps:$4 sm:$0xff]   ;;  %s2658_s23 = scalar_lea.vmem [#allocation2], %s1701_s17  ;;  %s1787_s25 = sshll.u32 %s2121_s22, 8 }
  0x1b   : > { %745 = vmatprep.subr.bf16.mxu0 %v1943_v11  ;;  %488 = vmatprep.mubr.bf16.mxu1 %v2066_v3  ;;  %v1975_v1 = vld [vmem:[%s2730_s3 + $0x14] ss:$8 sps:$4 sm:$0xff]   ;;  %v1973_v4 = vld [vmem:[%s2730_s3 + $0x10] ss:$8 sps:$4 sm:$0xff]   ;;  %v1978_v7 = vld [vmem:[%s2730_s3 + $0x24] ss:$8 sps:$4 sm:$0xff]   ;;  %s2676_s7 = scalar_lea.hbm %s2732_s5, %s1787_s25 }
  0x1c   : > { %1821 = vmatpush3.bf16.msra.mxu1 %v1956_v20  ;;  %v1979_v20 = vld [vmem:[%s2730_s3 + $0x30] ss:$8 sps:$4 sm:$0xff]   ;;  %s1635_s26 = sshll.u32 %s2658_s23, 4  ;;  %s2686_s22 = scalar_lea.sflag [#allocation3], %s216_s16  ;;  %s2678_s26 = int_to_ptr.vmem [resolvable:$true] %s1635_s26 }
  0x1d   : > { %1822 = vmatprep.subr.bf16.mxu1 %v1957_v21  ;;  %s2002_s8 = scalar_lea.vmem %s2678_s26, 256  ;;  %s2067_s9 = smov [#allocation2]  }
  0x1e   : > { %746 = vmatpush1.bf16.msra.mxu0 %v1941_v13  ;;  %p2003_p11 = scmp.ne.s32.totalorder %s2678_s26, %s2002_s8  ;;  %s2006_s10 = sshll.u32 %s2067_s9, 4  ;;  %s2007_s10 = int_to_ptr.vmem [resolvable:$false] %s2006_s10 }
  0x1f   : > { %747 = vmatprep.subr.bf16.mxu0 %v1946_v14  ;;  %s2008_s11 = scalar_lea.vmem %s2007_s10, 512  ;;  %p2009_p0 = scmp.lt.s32.totalorder %s2678_s26, %s2007_s10 }
  0x20   : > { %1823 = vmatpush3.bf16.msra.mxu1 %v1957_v21  ;;  %p2004_p12 = pnand %p2003_p11, %p2138_p5  ;;  %p2010_p1 = scmp.lt.s32.totalorder %s2008_s11, %s2002_s8 }
  0x21   : > { %1718 = vmatmul.mubr.msk.bf16.gmra.mrb[4].mxu0 %vm295_vm1, %v1929_v15  ;;  %1727 = vmatmul.mubr.msk.bf16.gmra.mrb[4].mxu1 %vm295_vm1, %v1929_v15  ;;  %v1976_v15 = vld [vmem:[%s2730_s3 + $0x20] ss:$8 sps:$4 sm:$0xff]  }
  0x22   : > { %385 = vmatprep.mubr.bf16.mxu0 %v2066_v3  ;;  %748 = vmatpush1.bf16.msra.mxu0 %v1944_v16  ;;  %p2005_p13 = pneg %p2004_p12  ;;  %p2011_p2 = por %p2010_p1, %p2009_p0 }
  0x23   : > { %498 = vmatprep.mubr.bf16.mxu1 %v2066_v3  ;;  %749 = vmatprep.subr.bf16.mxu0 %v1949_v17  ;;  %v1981_v17 = vld [vmem:[%s2730_s3 + $0x34] ss:$8 sps:$4 sm:$0xff]  }
  0x24   : > { %1824 = vmatprep.subr.bf16.mxu1 %v1961_v25  ;;  %p2012_p3 = pnand %p2011_p2, %p2005_p13 }
  0x25   : > { %1825 = vmatpush3.bf16.msra.mxu1 %v1961_v25 }
  0x26   : > { %750 = vmatpush1.bf16.msra.mxu0 %v1947_v18  ;;  %1826 = vmatprep.subr.bf16.mxu1 %v1962_v28 }
  0x27   : > { %751 = vmatprep.subr.bf16.mxu0 %v1952_v19 }
  0x29   : > { %1719 = vmatmul.mubr.msk.bf16.gmra.mrb[8].mxu0 %vm295_vm1, %v1930_v22  ;;  %1728 = vmatmul.mubr.msk.bf16.gmra.mrb[8].mxu1 %vm295_vm1, %v1930_v22 }
  0x2a   : > { %395 = vmatprep.mubr.bf16.mxu0 %v2066_v3  ;;  %508 = vmatprep.mubr.bf16.mxu1 %v2066_v3 }
  0x2b   : > { %752 = vmatpush1.bf16.msra.mxu0 %v1950_v23  ;;  %1827 = vmatpush3.bf16.msra.mxu1 %v1962_v28  ;;  %v1984_v23 = vld [vmem:[%s2730_s3 + $0x44] ss:$8 sps:$4 sm:$0xff]  }
  0x2c   : > { %753 = vmatprep.subr.bf16.mxu0 %v1955_v24  ;;  %1828 = vmatprep.subr.bf16.mxu1 %v1966_v32 }
  0x2f   : > { %754 = vmatpush1.bf16.msra.mxu0 %v1953_v26  ;;  %1829 = vmatpush3.bf16.msra.mxu1 %v1966_v32  ;;  %v1987_v32 = vld [vmem:[%s2730_s3 + $0x54] ss:$8 sps:$4 sm:$0xff]  }
  0x30   : > { %755 = vmatprep.subr.bf16.mxu0 %v1960_v27  ;;  %1830 = vmatprep.subr.bf16.mxu1 %v1967_v38 }
  0x31   : > { %1720 = vmatmul.mubr.msk.bf16.gmra.mrb[12].mxu0 %vm295_vm1, %v1931_v29  ;;  %1729 = vmatmul.mubr.msk.bf16.gmra.mrb[12].mxu1 %vm295_vm1, %v1931_v29 }
  0x32   : > { %405 = vmatprep.mubr.bf16.mxu0 %v2066_v3  ;;  %518 = vmatprep.mubr.bf16.mxu1 %v2066_v3 }
  0x33   : > { %756 = vmatpush1.bf16.msra.mxu0 %v1958_v30  ;;  %1831 = vmatpush3.bf16.msra.mxu1 %v1967_v38  ;;  %v1982_v30 = vld [vmem:[%s2730_s3 + $0x40] ss:$8 sps:$4 sm:$0xff]  }
  0x34   : > { %757 = vmatprep.subr.bf16.mxu0 %v1965_v31  ;;  %1832 = vmatprep.subr.bf16.mxu1 %v1968_v39 }
  0x37   : > { %758 = vmatpush1.bf16.msra.mxu0 %v1963_v33  ;;  %1833 = vmatpush3.bf16.msra.mxu1 %v1968_v39 }
  0x38   : > { %1834 = vmatprep.subr.bf16.mxu1 %v1969_v40 }
  0x39   : > { %1721 = vmatmul.mubr.msk.bf16.gmra.mrb[16].mxu0 %vm295_vm1, %v1932_v34  ;;  %1730 = vmatmul.mubr.msk.bf16.gmra.mrb[16].mxu1 %vm295_vm1, %v1932_v34 }
  0x3a   : > { %415 = vmatprep.mubr.bf16.mxu0 %v2066_v3  ;;  %528 = vmatprep.mubr.bf16.mxu1 %v2066_v3 }
  0x3b   : > { %1835 = vmatpush3.bf16.msra.mxu1 %v1969_v40 }
  0x3c   : > { %1089 = vmatprep.subr.bf16.mxu1 %v1972_v41 }
  0x41   : > { %1722 = vmatmul.mubr.msk.bf16.gmra.mrb[20].mxu0 %vm295_vm1, %v1933_v35  ;;  %1731 = vmatmul.mubr.msk.bf16.gmra.mrb[20].mxu1 %vm295_vm1, %v1933_v35  ;;  %v1985_v35 = vld [vmem:[%s2730_s3 + $0x50] ss:$8 sps:$4 sm:$0xff]  }
  0x42   : > { %425 = vmatprep.mubr.bf16.mxu0 %v2066_v3  ;;  %538 = vmatprep.mubr.bf16.mxu1 %v2066_v3 }
  0x49   : > { %1723 = vmatmul.mubr.msk.bf16.gmra.mrb[24].mxu0 %vm295_vm1, %v1934_v36  ;;  %1732 = vmatmul.mubr.msk.bf16.gmra.mrb[24].mxu1 %vm295_vm1, %v1934_v36 }
  0x4a   : > { %435 = vmatprep.mubr.bf16.mxu0 %v2066_v3  ;;  %548 = vmatprep.mubr.bf16.mxu1 %v2066_v3 }
  0x51   : > { %1724 = vmatmul.mubr.msk.bf16.gmra.mrb[28].mxu0 %vm295_vm1, %v1935_v37  ;;  %1733 = vmatmul.mubr.msk.bf16.gmra.mrb[28].mxu1 %vm295_vm1, %v1935_v37 }
  0x52   : > { %775 = vmatprep.mubr.bf16.mxu0 %v2066_v3 }
  0xec   : > { %v367_v42 = vpop.f32.mrb[0].mxu0  ;;  %v2280_v43 = vpop.f32.mrb[0].mxu1 }
  0xed   : > { %v2282_v44 = vpop.f32.mrb[1].mxu0  ;;  %v2284_v45 = vpop.f32.mrb[1].mxu1  ;;  %v559_v48 = vmax.f32 %v367_v42, 0.0 }
  0xee   : > { %v371_v46 = vpop.f32.mrb[2].mxu0  ;;  %v2286_v47 = vpop.f32.mrb[2].mxu1 }
  0xef   : > { %v560_v49 = vmax.f32 %v371_v46, 0.0  ;;  %v2288_v50 = vpop.f32.mrb[3].mxu0  ;;  %v2290_v51 = vpop.f32.mrb[3].mxu1 }
  0xf1   : > { %v575_v52 = vpack.c.bf16 %v560_v49, %v559_v48 }
  0xf3   : > { %776 = vmatmul.mubr.bf16.vlgmr.msra.gmra.mrb[32].mxu0 %v575_v52  ;;  %1836 = vmatprep.mubr.bf16.mxu1 %v575_v52 }
  0xf4   : > { %v377_v53 = vpop.f32.mrb[4].mxu0  ;;  %785 = vmatprep.mubr.bf16.mxu0 %v2066_v3  ;;  %v2293_v54 = vpop.f32.mrb[4].mxu1 }
  0xf5   : > { %v2295_v55 = vpop.f32.mrb[5].mxu0  ;;  %v2297_v56 = vpop.f32.mrb[5].mxu1  ;;  %v561_v59 = vmax.f32 %v377_v53, 0.0 }
  0xf6   : > { %v381_v57 = vpop.f32.mrb[6].mxu0  ;;  %v2299_v58 = vpop.f32.mrb[6].mxu1 }
  0xf7   : > { %v562_v60 = vmax.f32 %v381_v57, 0.0  ;;  %v2301_v61 = vpop.f32.mrb[7].mxu0  ;;  %v2303_v62 = vpop.f32.mrb[7].mxu1 }
  0xf9   : > { %v576_v0 = vpack.c.bf16 %v562_v60, %v561_v59 }
  0xfb   : > { %786 = vmatmul.mubr.bf16.gmra.mrb[36].mxu0 %v576_v0  ;;  %1837 = vmatmul.mubr.bf16.vlgmr.msra.gmra.mrb[32].mxu1 %v576_v0 }
  0xfc   : > { %v387_v2 = vpop.f32.mrb[8].mxu0  ;;  %795 = vmatprep.mubr.bf16.mxu0 %v2066_v3  ;;  %1090 = vmatpush1.bf16.msra.mxu1 %v1970_v63  ;;  %v2315_v5 = vpop.f32.mrb[8].mxu1 }
  0xfd   : > { %v2317_v6 = vpop.f32.mrb[9].mxu0  ;;  %1091 = vmatprep.subr.bf16.mxu1 %v1975_v1  ;;  %v2322_v8 = vpop.f32.mrb[9].mxu1  ;;  %v563_v11 = vmax.f32 %v387_v2, 0.0 }
  0xfe   : > { %v391_v9 = vpop.f32.mrb[10].mxu0  ;;  %v2324_v10 = vpop.f32.mrb[10].mxu1 }
  0xff   : > { %v564_v12 = vmax.f32 %v391_v9, 0.0  ;;  %v2326_v13 = vpop.f32.mrb[11].mxu0  ;;  %v2328_v14 = vpop.f32.mrb[11].mxu1 }
 0x100   : > { %1092 = vmatpush1.bf16.msra.mxu1 %v1973_v4 }
 0x101   : > { %v577_v16 = vpack.c.bf16 %v564_v12, %v563_v11  ;;  %1093 = vmatprep.subr.bf16.mxu1 %v1978_v7 }
 0x103   : > { %796 = vmatmul.mubr.bf16.gmra.mrb[40].mxu0 %v577_v16  ;;  %1840 = vmatprep.mubr.bf16.mxu1 %v577_v16 }
 0x104   : > { %v397_v18 = vpop.f32.mrb[12].mxu0  ;;  %805 = vmatprep.mubr.bf16.mxu0 %v2066_v3  ;;  %1094 = vmatpush1.bf16.msra.mxu1 %v1976_v15  ;;  %v2337_v19 = vpop.f32.mrb[12].mxu1 }
 0x105   : > { %v2342_v21 = vpop.f32.mrb[13].mxu0  ;;  %1095 = vmatprep.subr.bf16.mxu1 %v1981_v17  ;;  %v2344_v22 = vpop.f32.mrb[13].mxu1  ;;  %v565_v26 = vmax.f32 %v397_v18, 0.0 }
 0x106   : > { %v401_v24 = vpop.f32.mrb[14].mxu0  ;;  %v2349_v25 = vpop.f32.mrb[14].mxu1 }
 0x107   : > { %v566_v27 = vmax.f32 %v401_v24, 0.0  ;;  %v2351_v28 = vpop.f32.mrb[15].mxu0  ;;  %v2353_v29 = vpop.f32.mrb[15].mxu1 }
 0x108   : > { %1096 = vmatpush1.bf16.msra.mxu1 %v1979_v20 }
 0x109   : > { %v578_v31 = vpack.c.bf16 %v566_v27, %v565_v26  ;;  %1097 = vmatprep.subr.bf16.mxu1 %v1984_v23 }
 0x10b   : > { %806 = vmatmul.mubr.bf16.gmra.mrb[44].mxu0 %v578_v31  ;;  %1841 = vmatmul.mubr.bf16.gmra.mrb[36].mxu1 %v578_v31 }
 0x10c   : > { %v407_v33 = vpop.f32.mrb[16].mxu0  ;;  %815 = vmatprep.mubr.bf16.mxu0 %v2066_v3  ;;  %v2362_v34 = vpop.f32.mrb[16].mxu1  ;;  %1098 = vmatpush1.bf16.msra.mxu1 %v1982_v30 }
 0x10d   : > { %v2367_v36 = vpop.f32.mrb[17].mxu0  ;;  %v2369_v37 = vpop.f32.mrb[17].mxu1  ;;  %1099 = vmatprep.subr.bf16.mxu1 %v1987_v32  ;;  %v567_v40 = vmax.f32 %v407_v33, 0.0  ;;  %v1990_v32 = vld [vmem:[%s2730_s3 + $0x64] ss:$8 sps:$4 sm:$0xff]  }
 0x10e   : > { %v411_v38 = vpop.f32.mrb[18].mxu0  ;;  %v2371_v39 = vpop.f32.mrb[18].mxu1  ;;  %v1988_v33 = vld [vmem:[%s2730_s3 + $0x60] ss:$8 sps:$4 sm:$0xff]  }
 0x10f   : > { %v568_v41 = vmax.f32 %v411_v38, 0.0  ;;  %v2373_v42 = vpop.f32.mrb[19].mxu0  ;;  %v2375_v46 = vpop.f32.mrb[19].mxu1 }
 0x110   : > { %1100 = vmatpush1.bf16.msra.mxu1 %v1985_v35 }
 0x111   : > { %v579_v48 = vpack.c.bf16 %v568_v41, %v567_v40  ;;  %1101 = vmatprep.subr.bf16.mxu1 %v1990_v32  ;;  %v1993_v41 = vld [vmem:[%s2730_s3 + $0x74] ss:$8 sps:$4 sm:$0xff]  }
 0x113   : > { %816 = vmatmul.mubr.bf16.gmra.mrb[48].mxu0 %v579_v48  ;;  %1844 = vmatprep.mubr.bf16.mxu1 %v579_v48 }
 0x114   : > { %v417_v49 = vpop.f32.mrb[20].mxu0  ;;  %825 = vmatprep.mubr.bf16.mxu0 %v2066_v3  ;;  %v2378_v52 = vpop.f32.mrb[20].mxu1  ;;  %1102 = vmatpush1.bf16.msra.mxu1 %v1988_v33 }
 0x115   : > { %v2380_v53 = vpop.f32.mrb[21].mxu0  ;;  %v2382_v57 = vpop.f32.mrb[21].mxu1  ;;  %v569_v63 = vmax.f32 %v417_v49, 0.0  ;;  %v1991_v49 = vld [vmem:[%s2730_s3 + $0x70] ss:$8 sps:$4 sm:$0xff]   ;;  %1103 = vmatprep.subr.bf16.mxu1 %v1993_v41 }
 0x116   : > { %v421_v59 = vpop.f32.mrb[22].mxu0  ;;  %v2384_v60 = vpop.f32.mrb[22].mxu1 }
 0x117   : > { %v570_v0 = vmax.f32 %v421_v59, 0.0  ;;  %v2386_v1 = vpop.f32.mrb[23].mxu0  ;;  %v2388_v2 = vpop.f32.mrb[23].mxu1 }
 0x118   : > { %1104 = vmatpush1.bf16.msra.mxu1 %v1991_v49 }
 0x119   : > { %v580_v4 = vpack.c.bf16 %v570_v0, %v569_v63 }
 0x11b   : > { %826 = vmatmul.mubr.bf16.gmra.mrb[52].mxu0 %v580_v4  ;;  %1845 = vmatmul.mubr.bf16.gmra.mrb[40].mxu1 %v580_v4  ;;  %v1994_v4 = vld [vmem:[%s2731_s4] sm:$0xff]  }
 0x11c   : > { %v427_v7 = vpop.f32.mrb[24].mxu0  ;;  %835 = vmatprep.mubr.bf16.mxu0 %v2066_v3  ;;  %v2391_v9 = vpop.f32.mrb[24].mxu1  ;;  %1852 = vmatprep.subr.bf16.mxu0 %v1994_v4 }
 0x11d   : > { %v2393_v11 = vpop.f32.mrb[25].mxu0  ;;  %v571_v15 = vmax.f32 %v427_v7, 0.0  ;;  %v2409_v35 = vpop.f32.mrb[25].mxu1  ;;  %v1995_v7 = vld [vmem:[%s2731_s4 + $0x8] sm:$0xff]   ;;  %1853 = vmatpush3.bf16.msra.mxu0 %v1994_v4 }
 0x11e   : > { %v431_v12 = vpop.f32.mrb[26].mxu0  ;;  %v2411_v38 = vpop.f32.mrb[26].mxu1  ;;  %1854 = vmatprep.subr.bf16.mxu0 %v1995_v7 }
 0x11f   : > { %v572_v16 = vmax.f32 %v431_v12, 0.0  ;;  %v2395_v17 = vpop.f32.mrb[27].mxu0  ;;  %v2413_v40 = vpop.f32.mrb[27].mxu1  ;;  %v1996_v12 = vld [vmem:[%s2731_s4 + $0x10] sm:$0xff]  }
 0x121   : > { %v581_v18 = vpack.c.bf16 %v572_v16, %v571_v15  ;;  %1855 = vmatpush3.bf16.msra.mxu0 %v1995_v7  ;;  %v1997_v15 = vld [vmem:[%s2731_s4 + $0x18] sm:$0xff]  }
 0x122   : > { %1856 = vmatprep.subr.bf16.mxu0 %v1996_v12 }
 0x123   : > { %836 = vmatmul.mubr.bf16.gmra.mrb[56].mxu0 %v581_v18  ;;  %1848 = vmatprep.mubr.bf16.mxu1 %v581_v18 }
 0x124   : > { %v437_v20 = vpop.f32.mrb[28].mxu0  ;;  %845 = vmatprep.mubr.bf16.mxu0 %v2066_v3  ;;  %v2418_v48 = vpop.f32.mrb[28].mxu1 }
 0x125   : > { %v2398_v23 = vpop.f32.mrb[29].mxu0  ;;  %v573_v26 = vmax.f32 %v437_v20, 0.0  ;;  %v2423_v59 = vpop.f32.mrb[29].mxu1  ;;  %1857 = vmatpush3.bf16.msra.mxu0 %v1996_v12 }
 0x126   : > { %v441_v24 = vpop.f32.mrb[30].mxu0  ;;  %v2425_v63 = vpop.f32.mrb[30].mxu1  ;;  %1858 = vmatprep.subr.bf16.mxu0 %v1997_v15 }
 0x127   : > { %v574_v27 = vmax.f32 %v441_v24, 0.0  ;;  %v2400_v30 = vpop.f32.mrb[31].mxu0  ;;  %v2427_v0 = vpop.f32.mrb[31].mxu1 }
 0x129   : > { %v582_v31 = vpack.c.bf16 %v574_v27, %v573_v26  ;;  %1859 = vmatpush3.bf16.msra.mxu0 %v1997_v15 }
 0x12b   : > { %846 = vmatmul.mubr.bf16.gmra.mrb[60].mxu0 %v582_v31  ;;  %1849 = vmatmul.mubr.bf16.gmra.mrb[44].mxu1 %v582_v31 }
 0x12c   : > { %1121 = vmatprep.mubr.bf16.mxu1 %v2066_v3 }
 0x1c6   : > { %v777_v16 = vpop.f32.mrb[32].mxu0 }
 0x1c7   : > { %v953_v18 = vadd.f32 %v777_v16, %v2282_v44  ;;  %v779_v20 = vpop.f32.mrb[33].mxu0 }
 0x1c8   : > { %v2443_v24 = vadd.f32 %v779_v20, %v2280_v43  ;;  %v781_v26 = vpop.f32.mrb[34].mxu0 }
 0x1c9   : > { %v954_v27 = vadd.f32 %v781_v26, %v2288_v50  ;;  %v783_v31 = vpop.f32.mrb[35].mxu0  ;;  %v969_v33 = vmax.f32 %v953_v18, 0.0 }
 0x1ca   : > { %v2447_v32 = vadd.f32 %v783_v31, %v2286_v47 }
 0x1cb   : > { %v970_v41 = vmax.f32 %v954_v27, 0.0 }
 0x1cd   : > { %v985_v49 = vpack.c.bf16 %v970_v41, %v969_v33 }
 0x1ce   : > { %v787_v4 = vpop.f32.mrb[36].mxu0  ;;  %v1838_v7 = vpop.f32.mrb[32].mxu1 }
 0x1cf   : > { %v955_v12 = vadd.f32 %v787_v4, %v2295_v55  ;;  %v2451_v44 = vadd.f32 %v1838_v7, %v2297_v56  ;;  %v789_v15 = vpop.f32.mrb[37].mxu0  ;;  %v890_v43 = vpop.f32.mrb[33].mxu1  ;;  %1122 = vmatmul.mubr.bf16.vlgmr.msra.gmra.mrb[48].mxu1 %v985_v49 }
 0x1d0   : > { %v2454_v16 = vadd.f32 %v789_v15, %v2293_v54  ;;  %v2457_v50 = vadd.f32 %v890_v43, %v2284_v45  ;;  %v791_v47 = vpop.f32.mrb[38].mxu0  ;;  %v1839_v18 = vpop.f32.mrb[34].mxu1  ;;  %1131 = vmatprep.mubr.bf16.mxu1 %v2066_v3 }
 0x1d1   : > { %v956_v20 = vadd.f32 %v791_v47, %v2301_v61  ;;  %v2462_v55 = vadd.f32 %v1839_v18, %v2303_v62  ;;  %v793_v56 = vpop.f32.mrb[39].mxu0  ;;  %v893_v26 = vpop.f32.mrb[35].mxu1  ;;  %v971_v31 = vmax.f32 %v955_v12, 0.0 }
 0x1d2   : > { %v2465_v27 = vadd.f32 %v793_v56, %v2299_v58  ;;  %v2468_v54 = vadd.f32 %v893_v26, %v2290_v51 }
 0x1d3   : > { %v972_v45 = vmax.f32 %v956_v20, 0.0 }
 0x1d5   : > { %v986_v33 = vpack.c.bf16 %v972_v45, %v971_v31 }
 0x1d6   : > { %v797_v41 = vpop.f32.mrb[40].mxu0 }
 0x1d7   : > { %v957_v49 = vadd.f32 %v797_v41, %v2317_v6  ;;  %v799_v4 = vpop.f32.mrb[41].mxu0  ;;  %1132 = vmatmul.mubr.bf16.gmra.mrb[52].mxu1 %v986_v33 }
 0x1d8   : > { %v2472_v61 = vadd.f32 %v799_v4, %v2315_v5  ;;  %v801_v62 = vpop.f32.mrb[42].mxu0  ;;  %1141 = vmatprep.mubr.bf16.mxu1 %v2066_v3 }
 0x1d9   : > { %v958_v58 = vadd.f32 %v801_v62, %v2326_v13  ;;  %v803_v7 = vpop.f32.mrb[43].mxu0  ;;  %v973_v12 = vmax.f32 %v957_v49, 0.0 }
 0x1da   : > { %v2477_v51 = vadd.f32 %v803_v7, %v2324_v10 }
 0x1db   : > { %v974_v15 = vmax.f32 %v958_v58, 0.0 }
 0x1dd   : > { %v987_v43 = vpack.c.bf16 %v974_v15, %v973_v12 }
 0x1de   : > { %v807_v47 = vpop.f32.mrb[44].mxu0  ;;  %v1842_v18 = vpop.f32.mrb[36].mxu1 }
 0x1df   : > { %v959_v6 = vadd.f32 %v807_v47, %v2342_v21  ;;  %v2481_v20 = vadd.f32 %v1842_v18, %v2344_v22  ;;  %v809_v5 = vpop.f32.mrb[45].mxu0  ;;  %v906_v56 = vpop.f32.mrb[37].mxu1  ;;  %1142 = vmatmul.mubr.bf16.gmra.mrb[56].mxu1 %v987_v43 }
 0x1e0   : > { %v2484_v26 = vadd.f32 %v809_v5, %v2337_v19  ;;  %v2487_v13 = vadd.f32 %v906_v56, %v2322_v8  ;;  %v811_v10 = vpop.f32.mrb[46].mxu0  ;;  %v1843_v31 = vpop.f32.mrb[38].mxu1  ;;  %1151 = vmatprep.mubr.bf16.mxu1 %v2066_v3 }
 0x1e1   : > { %v960_v45 = vadd.f32 %v811_v10, %v2351_v28  ;;  %v2492_v21 = vadd.f32 %v1843_v31, %v2353_v29  ;;  %v813_v22 = vpop.f32.mrb[47].mxu0  ;;  %v909_v33 = vpop.f32.mrb[39].mxu1  ;;  %v975_v49 = vmax.f32 %v959_v6, 0.0 }
 0x1e2   : > { %v2495_v41 = vadd.f32 %v813_v22, %v2349_v25  ;;  %v2498_v19 = vadd.f32 %v909_v33, %v2328_v14 }
 0x1e3   : > { %v976_v8 = vmax.f32 %v960_v45, 0.0 }
 0x1e5   : > { %v988_v4 = vpack.c.bf16 %v976_v8, %v975_v49 }
 0x1e6   : > { %v817_v62 = vpop.f32.mrb[48].mxu0 }
 0x1e7   : > { %v961_v58 = vadd.f32 %v817_v62, %v2367_v36  ;;  %v819_v7 = vpop.f32.mrb[49].mxu0  ;;  %1152 = vmatmul.mubr.bf16.gmra.mrb[60].mxu1 %v988_v4 }
 0x1e8   : > { %v2502_v28 = vadd.f32 %v819_v7, %v2362_v34  ;;  %v821_v29 = vpop.f32.mrb[50].mxu0  ;;  %1161 = vmatprep.mubr.bf16.mxu1 %v2066_v3 }
 0x1e9   : > { %v962_v25 = vadd.f32 %v821_v29, %v2373_v42  ;;  %v823_v12 = vpop.f32.mrb[51].mxu0  ;;  %v977_v15 = vmax.f32 %v961_v58, 0.0 }
 0x1ea   : > { %v2507_v14 = vadd.f32 %v823_v12, %v2371_v39 }
 0x1eb   : > { %v978_v43 = vmax.f32 %v962_v25, 0.0 }
 0x1ed   : > { %v989_v47 = vpack.c.bf16 %v978_v43, %v977_v15 }
 0x1ee   : > { %v827_v18 = vpop.f32.mrb[52].mxu0  ;;  %v1846_v6 = vpop.f32.mrb[40].mxu1 }
 0x1ef   : > { %v963_v36 = vadd.f32 %v827_v18, %v2380_v53  ;;  %v2511_v5 = vadd.f32 %v1846_v6, %v2382_v57  ;;  %v829_v34 = vpop.f32.mrb[53].mxu0  ;;  %v922_v56 = vpop.f32.mrb[41].mxu1  ;;  %1162 = vmatmul.mubr.bf16.gmra.mrb[64].mxu1 %v989_v47 }
 0x1f0   : > { %v2514_v10 = vadd.f32 %v829_v34, %v2378_v52  ;;  %v2517_v42 = vadd.f32 %v922_v56, %v2369_v37  ;;  %v831_v39 = vpop.f32.mrb[54].mxu0  ;;  %v1847_v31 = vpop.f32.mrb[42].mxu1  ;;  %1171 = vmatprep.mubr.bf16.mxu1 %v2066_v3 }
 0x1f1   : > { %v964_v45 = vadd.f32 %v831_v39, %v2386_v1  ;;  %v2522_v53 = vadd.f32 %v1847_v31, %v2388_v2  ;;  %v833_v57 = vpop.f32.mrb[55].mxu0  ;;  %v925_v22 = vpop.f32.mrb[43].mxu1  ;;  %v979_v49 = vmax.f32 %v963_v36, 0.0 }
 0x1f2   : > { %v2525_v33 = vadd.f32 %v833_v57, %v2384_v60  ;;  %v2528_v52 = vadd.f32 %v925_v22, %v2375_v46 }
 0x1f3   : > { %v980_v37 = vmax.f32 %v964_v45, 0.0 }
 0x1f5   : > { %v990_v8 = vpack.c.bf16 %v980_v37, %v979_v49 }
 0x1f6   : > { %v837_v4 = vpop.f32.mrb[56].mxu0 }
 0x1f7   : > { %v965_v62 = vadd.f32 %v837_v4, %v2393_v11  ;;  %v839_v58 = vpop.f32.mrb[57].mxu0  ;;  %1172 = vmatmul.mubr.bf16.gmra.mrb[68].mxu1 %v990_v8 }
 0x1f8   : > { %v2532_v1 = vadd.f32 %v839_v58, %v2391_v9  ;;  %v841_v2 = vpop.f32.mrb[58].mxu0  ;;  %1181 = vmatprep.mubr.bf16.mxu1 %v2066_v3 }
 0x1f9   : > { %v966_v60 = vadd.f32 %v841_v2, %v2395_v17  ;;  %v843_v7 = vpop.f32.mrb[59].mxu0  ;;  %v981_v29 = vmax.f32 %v965_v62, 0.0 }
 0x1fa   : > { %v2537_v46 = vadd.f32 %v843_v7, %v2411_v38 }
 0x1fb   : > { %v982_v25 = vmax.f32 %v966_v60, 0.0 }
 0x1fd   : > { %v991_v12 = vpack.c.bf16 %v982_v25, %v981_v29 }
 0x1fe   : > { %v847_v15 = vpop.f32.mrb[60].mxu0  ;;  %v1850_v43 = vpop.f32.mrb[44].mxu1 }
 0x1ff   : > { %v967_v11 = vadd.f32 %v847_v15, %v2398_v23  ;;  %v2541_v47 = vadd.f32 %v1850_v43, %v2423_v59  ;;  %v849_v9 = vpop.f32.mrb[61].mxu0  ;;  %v938_v18 = vpop.f32.mrb[45].mxu1  ;;  %1182 = vmatmul.mubr.bf16.gmra.mrb[72].mxu1 %v991_v12 }
 0x200   : > { %v2544_v6 = vadd.f32 %v849_v9, %v2418_v48  ;;  %v2547_v17 = vadd.f32 %v938_v18, %v2409_v35  ;;  %v851_v38 = vpop.f32.mrb[62].mxu0  ;;  %v1851_v36 = vpop.f32.mrb[46].mxu1  ;;  %1191 = vmatprep.mubr.bf16.mxu1 %v2066_v3  ;;  %v1998_v3 = vld [vmem:[%s2731_s4 + $0x20] sm:$0xff]  }
 0x201   : > { %v968_v34 = vadd.f32 %v851_v38, %v2400_v30  ;;  %v2552_v23 = vadd.f32 %v1851_v36, %v2427_v0  ;;  %v853_v59 = vpop.f32.mrb[63].mxu0  ;;  %v941_v56 = vpop.f32.mrb[47].mxu1  ;;  %v983_v31 = vmax.f32 %v967_v11, 0.0  ;;  %1860 = vmatprep.subr.bf16.mxu0 %v1998_v3  ;;  %v1999_v30 = vld [vmem:[%s2731_s4 + $0x28] sm:$0xff]  }
 0x202   : > { %v2555_v39 = vadd.f32 %v853_v59, %v2425_v63  ;;  %v2558_v48 = vadd.f32 %v941_v56, %v2413_v40  ;;  %1861 = vmatpush3.bf16.msra.mxu0 %v1998_v3  ;;  %v2000_v40 = vld [vmem:[%s2731_s4 + $0x30] sm:$0xff]   ;;  %v2001_v63 = vld [vmem:[%s2731_s4 + $0x38] sm:$0xff]  }
 0x203   : > { %v984_v35 = vmax.f32 %v968_v34, 0.0  ;;  %1862 = vmatprep.subr.bf16.mxu0 %v1999_v30 }
 0x205   : > { %v992_v45 = vpack.c.bf16 %v984_v35, %v983_v31 }
 0x206   : > { %1863 = vmatpush3.bf16.msra.mxu0 %v1999_v30 }
 0x207   : > { %1192 = vmatmul.mubr.bf16.gmra.mrb[76].mxu1 %v992_v45  ;;  %1864 = vmatprep.subr.bf16.mxu0 %v2000_v40 }
 0x20a   : > { %1865 = vmatpush3.bf16.msra.mxu0 %v2000_v40 }
 0x20b   : > { %1866 = vmatprep.subr.bf16.mxu0 %v2001_v63 }
 0x20e   : > { %1867 = vmatpush3.bf16.msra.mxu0 %v2001_v63 }
 0x2a2   : > { %v1123_v0 = vpop.f32.mrb[48].mxu1 }
 0x2a3   : > { %v1218_v57 = vadd.f32 %v2443_v24, %v1123_v0  ;;  %v1125_v22 = vpop.f32.mrb[49].mxu1 }
 0x2a4   : > { %v2574_v49 = vadd.f32 %v2457_v50, %v1125_v22  ;;  %v1127_v37 = vpop.f32.mrb[50].mxu1 }
 0x2a5   : > { %v1219_v8 = vadd.f32 %v2447_v32, %v1127_v37  ;;  %v1129_v4 = vpop.f32.mrb[51].mxu1  ;;  %v1234_v58 = vmax.f32 %v1218_v57, 0.0 }
 0x2a6   : > { %v2578_v62 = vadd.f32 %v2468_v54, %v1129_v4 }
 0x2a7   : > { %v1235_v2 = vmax.f32 %v1219_v8, 0.0 }
 0x2a9   : > { %v1250_v60 = vpack.c.bf16 %v1235_v2, %v1234_v58 }
 0x2aa   : > { %v1133_v7 = vpop.f32.mrb[52].mxu1 }
 0x2ab   : > { %v1220_v29 = vadd.f32 %v2454_v16, %v1133_v7  ;;  %v1135_v25 = vpop.f32.mrb[53].mxu1  ;;  %1868 = vmatprep.mubr.bf16.mxu0 %v1250_v60 }
 0x2ac   : > { %v2582_v24 = vadd.f32 %v2451_v44, %v1135_v25  ;;  %v1137_v50 = vpop.f32.mrb[54].mxu1 }
 0x2ad   : > { %v1221_v12 = vadd.f32 %v2465_v27, %v1137_v50  ;;  %v1139_v15 = vpop.f32.mrb[55].mxu1  ;;  %v1236_v54 = vmax.f32 %v1220_v29, 0.0 }
 0x2ae   : > { %v2586_v32 = vadd.f32 %v2462_v55, %v1139_v15 }
 0x2af   : > { %v1237_v43 = vmax.f32 %v1221_v12, 0.0 }
 0x2b1   : > { %v1251_v11 = vpack.c.bf16 %v1237_v43, %v1236_v54 }
 0x2b2   : > { %v1143_v9 = vpop.f32.mrb[56].mxu1 }
 0x2b3   : > { %v1222_v18 = vadd.f32 %v2472_v61, %v1143_v9  ;;  %v1145_v38 = vpop.f32.mrb[57].mxu1  ;;  %1869 = vmatmul.mubr.bf16.vlgmr.msra.gmra.mrb[64].mxu0 %v1251_v11 }
 0x2b4   : > { %v2590_v16 = vadd.f32 %v2487_v13, %v1145_v38  ;;  %v1147_v44 = vpop.f32.mrb[58].mxu1 }
 0x2b5   : > { %v1223_v36 = vadd.f32 %v2477_v51, %v1147_v44  ;;  %v1149_v34 = vpop.f32.mrb[59].mxu1  ;;  %v1238_v55 = vmax.f32 %v1222_v18, 0.0 }
 0x2b6   : > { %v2594_v27 = vadd.f32 %v2498_v19, %v1149_v34 }
 0x2b7   : > { %v1239_v59 = vmax.f32 %v1223_v36, 0.0 }
 0x2b9   : > { %v1252_v56 = vpack.c.bf16 %v1239_v59, %v1238_v55 }
 0x2ba   : > { %v1153_v31 = vpop.f32.mrb[60].mxu1 }
 0x2bb   : > { %v1224_v35 = vadd.f32 %v2484_v26, %v1153_v31  ;;  %v1155_v45 = vpop.f32.mrb[61].mxu1  ;;  %1872 = vmatprep.mubr.bf16.mxu0 %v1252_v56 }
 0x2bc   : > { %v2598_v61 = vadd.f32 %v2481_v20, %v1155_v45  ;;  %v1157_v13 = vpop.f32.mrb[62].mxu1 }
 0x2bd   : > { %v1225_v3 = vadd.f32 %v2495_v41, %v1157_v13  ;;  %v1159_v30 = vpop.f32.mrb[63].mxu1  ;;  %v1240_v19 = vmax.f32 %v1224_v35, 0.0 }
 0x2be   : > { %v2602_v51 = vadd.f32 %v2492_v21, %v1159_v30 }
 0x2bf   : > { %v1241_v40 = vmax.f32 %v1225_v3, 0.0 }
 0x2c1   : > { %v1253_v63 = vpack.c.bf16 %v1241_v40, %v1240_v19 }
 0x2c2   : > { %v1163_v0 = vpop.f32.mrb[64].mxu1 }
 0x2c3   : > { %v1226_v57 = vadd.f32 %v2502_v28, %v1163_v0  ;;  %v1165_v22 = vpop.f32.mrb[65].mxu1  ;;  %1873 = vmatmul.mubr.bf16.gmra.mrb[68].mxu0 %v1253_v63 }
 0x2c4   : > { %v2606_v26 = vadd.f32 %v2517_v42, %v1165_v22  ;;  %v1167_v20 = vpop.f32.mrb[66].mxu1 }
 0x2c5   : > { %v1227_v37 = vadd.f32 %v2507_v14, %v1167_v20  ;;  %v1169_v8 = vpop.f32.mrb[67].mxu1  ;;  %v1242_v21 = vmax.f32 %v1226_v57, 0.0 }
 0x2c6   : > { %v2610_v41 = vadd.f32 %v2528_v52, %v1169_v8 }
 0x2c7   : > { %v1243_v4 = vmax.f32 %v1227_v37, 0.0 }
 0x2c9   : > { %v1254_v58 = vpack.c.bf16 %v1243_v4, %v1242_v21 }
 0x2ca   : > { %v1173_v2 = vpop.f32.mrb[68].mxu1 }
 0x2cb   : > { %v1228_v60 = vadd.f32 %v2514_v10, %v1173_v2  ;;  %v1175_v7 = vpop.f32.mrb[69].mxu1  ;;  %1876 = vmatprep.mubr.bf16.mxu0 %v1254_v58 }
 0x2cc   : > { %v2614_v28 = vadd.f32 %v2511_v5, %v1175_v7  ;;  %v1177_v42 = vpop.f32.mrb[70].mxu1 }
 0x2cd   : > { %v1229_v29 = vadd.f32 %v2525_v33, %v1177_v42  ;;  %v1179_v25 = vpop.f32.mrb[71].mxu1  ;;  %v1244_v52 = vmax.f32 %v1228_v60, 0.0 }
 0x2ce   : > { %v2618_v14 = vadd.f32 %v2522_v53, %v1179_v25 }
 0x2cf   : > { %v1245_v50 = vmax.f32 %v1229_v29, 0.0 }
 0x2d1   : > { %v1255_v12 = vpack.c.bf16 %v1245_v50, %v1244_v52 }
 0x2d2   : > { %v1183_v15 = vpop.f32.mrb[72].mxu1 }
 0x2d3   : > { %v1230_v54 = vadd.f32 %v2532_v1, %v1183_v15  ;;  %v1185_v43 = vpop.f32.mrb[73].mxu1  ;;  %1877 = vmatmul.mubr.bf16.gmra.mrb[72].mxu0 %v1255_v12 }
 0x2d4   : > { %v2622_v10 = vadd.f32 %v2547_v17, %v1185_v43  ;;  %v1187_v5 = vpop.f32.mrb[74].mxu1 }
 0x2d5   : > { %v1231_v11 = vadd.f32 %v2537_v46, %v1187_v5  ;;  %v1189_v9 = vpop.f32.mrb[75].mxu1  ;;  %v1246_v53 = vmax.f32 %v1230_v54, 0.0 }
 0x2d6   : > { %v2626_v33 = vadd.f32 %v2558_v48, %v1189_v9 }
 0x2d7   : > { %v1247_v18 = vmax.f32 %v1231_v11, 0.0 }
 0x2d9   : > { %v1256_v38 = vpack.c.bf16 %v1247_v18, %v1246_v53 }
 0x2da   : > { %v1193_v44 = vpop.f32.mrb[76].mxu1 }
 0x2db   : > { %v1232_v36 = vadd.f32 %v2544_v6, %v1193_v44  ;;  %v1195_v34 = vpop.f32.mrb[77].mxu1  ;;  %1880 = vmatprep.mubr.bf16.mxu0 %v1256_v38 }
 0x2dc   : > { %v2630_v1 = vadd.f32 %v2541_v47, %v1195_v34  ;;  %v1197_v17 = vpop.f32.mrb[78].mxu1 }
 0x2dd   : > { %v1233_v55 = vadd.f32 %v2555_v39, %v1197_v17  ;;  %v1199_v59 = vpop.f32.mrb[79].mxu1  ;;  %v1248_v48 = vmax.f32 %v1232_v36, 0.0 }
 0x2de   : > { %v2634_v46 = vadd.f32 %v2552_v23, %v1199_v59 }
 0x2df   : > { %v1249_v56 = vmax.f32 %v1233_v55, 0.0 }
 0x2e1   : > { %v1257_v31 = vpack.c.bf16 %v1249_v56, %v1248_v48 }
 0x2e3   : > { %1881 = vmatmul.mubr.bf16.gmra.mrb[76].mxu0 %v1257_v31 }
 0x386   : > { %v1870_v35 = vpop.f32.mrb[64].mxu0 }
 0x387   : > { %v1453_v45 = vadd.f32 %v1870_v35, %v2582_v24  ;;  %v1356_v6 = vpop.f32.mrb[65].mxu0 }
 0x388   : > { %v1451_v13 = vadd.f32 %v2574_v49, %v1356_v6  ;;  %v1871_v3 = vpop.f32.mrb[66].mxu0 }
 0x389   : > { %v1469_v47 = vmax.f32 %v1453_v45, 0.0  ;;  %v1454_v30 = vadd.f32 %v1871_v3, %v2586_v32  ;;  %v1359_v19 = vpop.f32.mrb[67].mxu0 }
 0x38a   : > { %v1467_v39 = vmax.f32 %v1451_v13, 0.0  ;;  %v1452_v40 = vadd.f32 %v2578_v62, %v1359_v19 }
 0x38b   : > { %v1495_v23 = vrot.slane %v1469_v47, 4  ;;  %v1470_v63 = vmax.f32 %v1454_v30, 0.0 }
 0x38c   : > { %v1483_v0 = vrot.slane %v1467_v39, 4  ;;  %v1468_v57 = vmax.f32 %v1452_v40, 0.0 }
 0x38d   : > { %v1496_v22 = vmax.f32 %v1469_v47, %v1495_v23  ;;  %v1501_v20 = vrot.slane %v1470_v63, 4 }
 0x38e   : > { %v1484_v37 = vmax.f32 %v1467_v39, %v1483_v0  ;;  %v1489_v8 = vrot.slane %v1468_v57, 4 }
 0x38f   : > { %v1497_v24 = vrot.slane %v1496_v22, 2  ;;  %v1502_v21 = vmax.f32 %v1470_v63, %v1501_v20 }
 0x390   : > { %v1485_v4 = vrot.slane %v1484_v37, 2  ;;  %v1490_v49 = vmax.f32 %v1468_v57, %v1489_v8 }
 0x391   : > { %v1498_v58 = vmax.f32 %v1496_v22, %v1497_v24  ;;  %v1503_v2 = vrot.slane %v1502_v21, 2 }
 0x392   : > { %v1486_v60 = vmax.f32 %v1484_v37, %v1485_v4  ;;  %v1491_v32 = vrot.slane %v1490_v49, 2 }
 0x393   : > { %v1504_v7 = vmax.f32 %v1502_v21, %v1503_v2  ;;  %v1499_v62 = vrot.slane %v1498_v58, 1 }
 0x394   : > { %v1487_v42 = vrot.slane %v1486_v60, 1  ;;  %v1492_v29 = vmax.f32 %v1490_v49, %v1491_v32 }
 0x395   : > { %v1505_v25 = vrot.slane %v1504_v7, 1  ;;  %v1500_v9 = vmax.f32 %v1498_v58, %v1499_v62 }
 0x396   : > { %v1493_v52 = vrot.slane %v1492_v29, 1  ;;  %v1874_v50 = vpop.f32.mrb[68].mxu0  ;;  %v1488_v54 = vmax.f32 %v1486_v60, %v1487_v42 }
 0x397   : > { %v1457_v12 = vadd.f32 %v1874_v50, %v2598_v61  ;;  %v1372_v15 = vpop.f32.mrb[69].mxu0  ;;  %v1506_v44 = vmax.f32 %v1504_v7, %v1505_v25 }
 0x398   : > { %v1494_v43 = vmax.f32 %v1492_v29, %v1493_v52  ;;  %v1455_v5 = vadd.f32 %v2590_v16, %v1372_v15  ;;  %v1875_v11 = vpop.f32.mrb[70].mxu0 }
 0x399   : > { %v1473_v53 = vmax.f32 %v1457_v12, 0.0  ;;  %v1458_v18 = vadd.f32 %v1875_v11, %v2602_v51  ;;  %v1375_v38 = vpop.f32.mrb[71].mxu0 }
 0x39a   : > { %v1596_v36 = vsel %vm1595_vm2, %v1494_v43, %v1488_v54  ;;  %v1471_v34 = vmax.f32 %v1455_v5, 0.0  ;;  %v1456_v17 = vadd.f32 %v2594_v27, %v1375_v38 }
 0x39b   : > { %v1598_v61 = vsel %vm1597_vm3, %v1500_v9, %v1596_v36  ;;  %v1519_v55 = vrot.slane %v1473_v53, 4  ;;  %v1474_v59 = vmax.f32 %v1458_v18, 0.0 }
 0x39c   : > { %v1507_v48 = vrot.slane %v1471_v34, 4  ;;  %v1600_v16 = vsel %vm1599_vm4, %v1506_v44, %v1598_v61  ;;  %v1472_v56 = vmax.f32 %v1456_v17, 0.0 }
 0x39d   : > { %v1520_v31 = vmax.f32 %v1473_v53, %v1519_v55  ;;  %v1525_v35 = vrot.slane %v1474_v59, 4 }
 0x39e   : > { %v1508_v45 = vmax.f32 %v1471_v34, %v1507_v48  ;;  %v1513_v51 = vrot.slane %v1472_v56, 4 }
 0x39f   : > { %v1521_v6 = vrot.slane %v1520_v31, 2  ;;  %v1526_v13 = vmax.f32 %v1474_v59, %v1525_v35 }
 0x3a0   : > { %v1509_v3 = vrot.slane %v1508_v45, 2  ;;  %v1514_v47 = vmax.f32 %v1472_v56, %v1513_v51 }
 0x3a1   : > { %v1522_v30 = vmax.f32 %v1520_v31, %v1521_v6  ;;  %v1527_v19 = vrot.slane %v1526_v13, 2 }
 0x3a2   : > { %v1510_v27 = vmax.f32 %v1508_v45, %v1509_v3  ;;  %v1515_v39 = vrot.slane %v1514_v47, 2 }
 0x3a3   : > { %v1528_v40 = vmax.f32 %v1526_v13, %v1527_v19  ;;  %v1523_v0 = vrot.slane %v1522_v30, 1 }
 0x3a4   : > { %v1511_v23 = vrot.slane %v1510_v27, 1  ;;  %v1516_v63 = vmax.f32 %v1514_v47, %v1515_v39 }
 0x3a5   : > { %v1529_v22 = vrot.slane %v1528_v40, 1  ;;  %v1524_v2 = vmax.f32 %v1522_v30, %v1523_v0 }
 0x3a6   : > { %v1512_v57 = vmax.f32 %v1510_v27, %v1511_v23  ;;  %v1517_v20 = vrot.slane %v1516_v63, 1  ;;  %v1878_v37 = vpop.f32.mrb[72].mxu0 }
 0x3a7   : > { %v1461_v8 = vadd.f32 %v1878_v37, %v2614_v28  ;;  %v1388_v24 = vpop.f32.mrb[73].mxu0  ;;  %v1530_v42 = vmax.f32 %v1528_v40, %v1529_v22 }
 0x3a8   : > { %v1602_v21 = vsel %vm1601_vm5, %v1512_v57, %v1600_v16  ;;  %v1518_v4 = vmax.f32 %v1516_v63, %v1517_v20  ;;  %v1459_v49 = vadd.f32 %v2606_v26, %v1388_v24  ;;  %v1879_v58 = vpop.f32.mrb[74].mxu0 }
 0x3a9   : > { %v1477_v60 = vmax.f32 %v1461_v8, 0.0  ;;  %v1462_v32 = vadd.f32 %v1879_v58, %v2618_v14  ;;  %v1391_v7 = vpop.f32.mrb[75].mxu0 }
 0x3aa   : > { %v1604_v29 = vsel %vm1603_vm6, %v1518_v4, %v1602_v21  ;;  %v1475_v28 = vmax.f32 %v1459_v49, 0.0  ;;  %v1460_v62 = vadd.f32 %v2610_v41, %v1391_v7 }
 0x3ab   : > { %v1606_v25 = vsel %vm1605_vm7, %v1524_v2, %v1604_v29  ;;  %v1543_v52 = vrot.slane %v1477_v60, 4  ;;  %v1478_v50 = vmax.f32 %v1462_v32, 0.0 }
 0x3ac   : > { %v1531_v12 = vrot.slane %v1475_v28, 4  ;;  %v1476_v26 = vmax.f32 %v1460_v62, 0.0  ;;  %v1608_v15 = vsel %vm1607_vm8, %v1530_v42, %v1606_v25 }
 0x3ad   : > { %v1544_v54 = vmax.f32 %v1477_v60, %v1543_v52  ;;  %v1549_v43 = vrot.slane %v1478_v50, 4  ;;  %1619 = vst.msk [vmem:[%s2658_s23] sm:$0xff] %vm1618_vm9, %v1608_v15 }
 0x3ae   : > { %v1532_v14 = vmax.f32 %v1475_v28, %v1531_v12  ;;  %v1537_v5 = vrot.slane %v1476_v26, 4 }
 0x3af   : > { %v1545_v11 = vrot.slane %v1544_v54, 2  ;;  %v1550_v9 = vmax.f32 %v1478_v50, %v1549_v43 }
 0x3b0   : > { %v1533_v41 = vrot.slane %v1532_v14, 2  ;;  %v1538_v53 = vmax.f32 %v1476_v26, %v1537_v5 }
 0x3b1   : > { %v1546_v18 = vmax.f32 %v1544_v54, %v1545_v11  ;;  %v1551_v38 = vrot.slane %v1550_v9, 2 }
 0x3b2   : > { %v1534_v44 = vmax.f32 %v1532_v14, %v1533_v41  ;;  %v1539_v36 = vrot.slane %v1538_v53, 2 }
 0x3b3   : > { %v1552_v34 = vmax.f32 %v1550_v9, %v1551_v38  ;;  %v1547_v55 = vrot.slane %v1546_v18, 1 }
 0x3b4   : > { %v1535_v17 = vrot.slane %v1534_v44, 1  ;;  %v1540_v61 = vmax.f32 %v1538_v53, %v1539_v36 }
 0x3b5   : > { %v1553_v59 = vrot.slane %v1552_v34, 1  ;;  %v1548_v13 = vmax.f32 %v1546_v18, %v1547_v55 }
 0x3b6   : > { %v1541_v48 = vrot.slane %v1540_v61, 1  ;;  %v1882_v16 = vpop.f32.mrb[76].mxu0  ;;  %v1536_v35 = vmax.f32 %v1534_v44, %v1535_v17 }
 0x3b7   : > { %v1465_v56 = vadd.f32 %v1882_v16, %v2630_v1  ;;  %v1404_v31 = vpop.f32.mrb[77].mxu0  ;;  %v1554_v19 = vmax.f32 %v1552_v34, %v1553_v59 }
 0x3b8   : > { %v1542_v45 = vmax.f32 %v1540_v61, %v1541_v48  ;;  %v1463_v51 = vadd.f32 %v2622_v10, %v1404_v31  ;;  %v1883_v6 = vpop.f32.mrb[78].mxu0 }
 0x3b9   : > { %v1481_v3 = vmax.f32 %v1465_v56, 0.0  ;;  %v1466_v47 = vadd.f32 %v1883_v6, %v2634_v46  ;;  %v1407_v30 = vpop.f32.mrb[79].mxu0 }
 0x3ba   : > { %v1609_v27 = vsel %vm1595_vm2, %v1542_v45, %v1536_v35  ;;  %v1479_v39 = vmax.f32 %v1463_v51, 0.0  ;;  %v1464_v40 = vadd.f32 %v2626_v33, %v1407_v30 }
 0x3bb   : > { %v1610_v23 = vsel %vm1597_vm3, %v1548_v13, %v1609_v27  ;;  %v1567_v1 = vrot.slane %v1481_v3, 4  ;;  %v1482_v63 = vmax.f32 %v1466_v47, 0.0 }
 0x3bc   : > { %v1555_v0 = vrot.slane %v1479_v39, 4  ;;  %v1611_v57 = vsel %vm1599_vm4, %v1554_v19, %v1610_v23  ;;  %v1480_v10 = vmax.f32 %v1464_v40, 0.0 }
 0x3bd   : > { %v1568_v22 = vmax.f32 %v1481_v3, %v1567_v1  ;;  %v1573_v20 = vrot.slane %v1482_v63, 4 }
 0x3be   : > { %v1556_v37 = vmax.f32 %v1479_v39, %v1555_v0  ;;  %v1561_v8 = vrot.slane %v1480_v10, 4 }
 0x3bf   : > { %v1569_v46 = vrot.slane %v1568_v22, 2  ;;  %v1574_v24 = vmax.f32 %v1482_v63, %v1573_v20 }
 0x3c0   : > { %v1557_v21 = vrot.slane %v1556_v37, 2  ;;  %v1562_v4 = vmax.f32 %v1480_v10, %v1561_v8 }
 0x3c1   : > { %v1570_v49 = vmax.f32 %v1568_v22, %v1569_v46  ;;  %v1575_v33 = vrot.slane %v1574_v24, 2 }
 0x3c2   : > { %v1558_v58 = vmax.f32 %v1556_v37, %v1557_v21  ;;  %v1563_v2 = vrot.slane %v1562_v4, 2 }
 0x3c3   : > { %v1576_v60 = vmax.f32 %v1574_v24, %v1575_v33  ;;  %v1571_v42 = vrot.slane %v1570_v49, 1 }
 0x3c4   : > { %v1559_v32 = vrot.slane %v1558_v58, 1  ;;  %v1564_v7 = vmax.f32 %v1562_v4, %v1563_v2 }
 0x3c5   : > { %v1577_v28 = vrot.slane %v1576_v60, 1  ;;  %v1572_v50 = vmax.f32 %v1570_v49, %v1571_v42 }
 0x3c6   : > { %v1560_v29 = vmax.f32 %v1558_v58, %v1559_v32  ;;  %v1565_v62 = vrot.slane %v1564_v7, 1 }
 0x3c7   : > { %v1578_v12 = vmax.f32 %v1576_v60, %v1577_v28 }
 0x3c8   : > { %v1612_v25 = vsel %vm1601_vm5, %v1560_v29, %v1611_v57  ;;  %v1566_v52 = vmax.f32 %v1564_v7, %v1565_v62 }
 0x3ca   : > { %v1613_v26 = vsel %vm1603_vm6, %v1566_v52, %v1612_v25 }
 0x3cb   : > { %v1614_v15 = vsel %vm1605_vm7, %v1572_v50, %v1613_v26 }
 0x3cc   : > { %v1615_v54 = vsel %vm1607_vm8, %v1578_v12, %v1614_v15 }
 0x3cd   : > { %1620 = vst.msk [vmem:[%s2658_s23 + $0x8] sm:$0xff] %vm1618_vm9, %v1615_v54 }
 0x3ce   : > { %2015 = shalt.err (!%p2012_p3)
}
 0x3cf   : > { %s2016_s12 = scalar_lea.hbm %s2676_s7, 256  ;;  %s2020_s15 = scalar_lea.hbm %s2732_s5, 512 }
 0x3d0   : > { %p2017_p4 = scmp.ne.s32.totalorder %s2676_s7, %s2016_s12  ;;  %p2021_p9 = scmp.lt.u32.totalorder %s2676_s7, %s2732_s5 }
 0x3d1   : > { %p2022_p10 = scmp.lt.u32.totalorder %s2020_s15, %s2016_s12  ;;  %p2024_p12 = scmp.lt.u32.totalorder %s2016_s12, %s2676_s7 }
 0x3d2   : > { %p2018_p7 = pnand %p2017_p4, %p2138_p5 }
 0x3d3   : > { %p2023_p11 = por %p2022_p10, %p2021_p9 }
 0x3d4   : > { %p2019_p8 = pneg %p2018_p7 }
 0x3d5   : > { %p2025_p13 = por %p2024_p12, %p2023_p11 }
 0x3d7   : > { %p2026_p0 = pnand %p2025_p13, %p2019_p8 }
 0x3d9   : > { %2029 = shalt.err (!%p2026_p0)
}
 0x3da   : > { %s2068_s23 = smov 128   ;;  %s2069_s25 = smov 8  }
 0x3db   : > { %1884 = dma.vmem_to_hbm [thread:$0]  (%p2138_p5), %s2678_s26, 256, %s2676_s7, %s2686_s22, %s2068_s23, %s2068_s23, %s2069_s25  }
 0x3dc PF: > { %p1890_p1 = scmp.ge.s32.totalorder %s2064_s21, 2  ;;  %s1650_s30 = sand.u32 1, %s2052_s18  }
 0x3dd   : > { %s1651_s6 = scalar_lea.sflag [#allocation3], %s1650_s30 }
 0x3de   : > { %p1887_p2 = pnand %p1890_p1, %p2142_p6 }
 0x3e0   : > { %2047 = dma.done.wait (!%p1887_p2), %s1651_s6, 256  }
 0x3e1   : > { %2049 = vsyncadd (!%p1887_p2), %s1651_s6, 4294967040  ;;  %p15_p3 = scmp.ge.s32.totalorder %s2125_s24, 4   ;;  %s2735_s18 = smov %s2056_s19 }
 0x3e2   : > { %s2736_s19 = smov %s2060_s20  ;;  %s2737_s20 = smov %s2136_s27 }
 0x3e3   : > { %s2738_s21 = smov %s2125_s24  ;;  %17 = sbr.rel (!%p15_p3) target bundleno = 3 (0x3), region = 75 }
 0x3ea   :  { %1656 = vsyncpa [#allocation3], 1 }
 0x3eb   :  { %1658 = vsyncpa [#allocation3 + $0x1], 1 }

</bundles_post_ra>
